<compile_context>
chip_gen: v6e
topology: v6e:2x2x1
jax: 0.10.0
libtpu: 0.0.40
codegen_flags: <defaults>
</compile_context>

<pallas_src>
import jax
import jax.numpy as jnp
from jax.experimental import pallas as pl
from jax.experimental.pallas import tpu as pltpu

IN_FEATURES = 10
OUT_FEATURES = 1

LANE = 128        # TPU vreg lane width
MAX_TB = 1024     # max batch rows per tile; 2 bufs * 1024*128*4B = 1 MiB (safe on v5e/v6e/v7x)


def _round_up(n, m):
    return ((n + m - 1) // m) * m


def linear_vpu_kernel(x_ref, w_ref, b_ref, o_ref):
    """y[b] = sum_k x[b, k] * w[0, k] + bias  — VPU multiply + XLU lane reduce.

    x_ref: (TB, 128) f32 VMEM  — feature axis zero-padded to full lane width
    w_ref: (1, 128)  f32 VMEM  — weight row, zero-padded; resident across the grid
    b_ref: (1,)      f32 SMEM  — bias scalar
    o_ref: (1, TB)   f32 VMEM  — lane-dense output block (batch along lanes)
    """
    x = x_ref[...]                        # (TB, 128)
    w = w_ref[...]                        # (1, 128), sublane-broadcast
    y = jnp.sum(x * w, axis=-1)           # VALU mul + XLU lane-reduce -> (TB,)
    o_ref[0, :] = y + b_ref[0]            # unmasked, lane-dense store


@jax.jit
def question_asking_agent_forward(x, weight, bias):
    """Equivalent of QuestionAskingAgent.forward: y = x @ weight.T + bias.

    x:      (B, IN_FEATURES) float32
    weight: (OUT_FEATURES, IN_FEATURES) float32  (PyTorch convention, OUT=1)
    bias:   (OUT_FEATURES,) float32
    returns (B, OUT_FEATURES) float32
    """
    B = x.shape[0]

    # ---- one-time wrapper-side layout prep --------------------------------
    tb = min(MAX_TB, _round_up(B, LANE))       # batch tile, multiple of 128
    b_pad = _round_up(B, tb)                   # padded batch, multiple of tb
    num_tiles = b_pad // tb

    # Zero-pad features 10 -> 128 (lane axis) and batch B -> b_pad.
    x_p = jnp.zeros((b_pad, LANE), dtype=jnp.float32)
    x_p = x_p.at[:B, :IN_FEATURES].set(x.astype(jnp.float32))

    # Weight is already the (OUT=1, IN) row we need: no transpose, just pad.
    w_p = jnp.zeros((1, LANE), dtype=jnp.float32)
    w_p = w_p.at[:, :IN_FEATURES].set(weight.astype(jnp.float32))

    b_s = bias.astype(jnp.float32).reshape((OUT_FEATURES,))   # scalar for SMEM

    out = pl.pallas_call(
        linear_vpu_kernel,
        out_shape=jax.ShapeDtypeStruct((1, b_pad), jnp.float32),
        grid=(num_tiles,),
        in_specs=[
            pl.BlockSpec((tb, LANE), lambda i: (i, 0)),            # x tile (pipelined)
            pl.BlockSpec((1, LANE), lambda i: (0, 0)),             # weight row (resident)
            pl.BlockSpec(memory_space=pltpu.MemorySpace.SMEM),     # bias scalar
        ],
        out_specs=pl.BlockSpec((1, tb), lambda i: (0, i)),         # lane-dense output
        compiler_params=pltpu.CompilerParams(
            # Independent batch tiles: shard across TensorCores (v7x megacore).
            dimension_semantics=("parallel",),
        ),
    )(x_p, w_p, b_s)

    # Back to PyTorch layout (B, OUT_FEATURES).
    return out[0, :B].reshape(B, OUT_FEATURES)


if __name__ == "__main__":
    key = jax.random.PRNGKey(0)
    k_x, k_w, k_b, k_x2 = jax.random.split(key, 4)

    # Deterministic parameter init mimicking nn.Linear default
    # (uniform in [-1/sqrt(in_features), 1/sqrt(in_features)]).
    bound = 1.0 / (IN_FEATURES ** 0.5)
    weight = jax.random.uniform(
        k_w, (OUT_FEATURES, IN_FEATURES), dtype=jnp.float32,
        minval=-bound, maxval=bound)
    bias = jax.random.uniform(
        k_b, (OUT_FEATURES,), dtype=jnp.float32, minval=-bound, maxval=bound)

    # Small batch (the module's natural use case).
    B = 8
    x = jax.random.normal(k_x, (B, IN_FEATURES), dtype=jnp.float32)
    y = jax.block_until_ready(question_asking_agent_forward(x, weight, bias))
    y_ref = x @ weight.T + bias
    assert y.shape == (B, OUT_FEATURES)
    assert jnp.allclose(y, y_ref, atol=1e-5), "mismatch vs reference (B=8)"

    # Larger batch to exercise the tiled (multi-grid-step) path.
    B2 = 2500
    x2 = jax.random.normal(k_x2, (B2, IN_FEATURES), dtype=jnp.float32)
    y2 = jax.block_until_ready(question_asking_agent_forward(x2, weight, bias))
    y2_ref = x2 @ weight.T + bias
    assert y2.shape == (B2, OUT_FEATURES)
    assert jnp.allclose(y2, y2_ref, atol=1e-5), "mismatch vs reference (B=2500)"

    print("KERNEL_OK")
</pallas_src>

<mosaic_0001>
module attributes {stable_mosaic.version = 11 : i64} {
  func.func @linear_vpu_kernel(%arg0: i32, %arg1: memref<128x128xf32, #tpu.memory_space<vmem>>, %arg2: memref<1x128xf32, #tpu.memory_space<vmem>>, %arg3: memref<1xf32, #tpu.memory_space<smem>>, %arg4: memref<1x128xf32, #tpu.memory_space<vmem>>) attributes {dimension_semantics = [#tpu.dimension_semantics<parallel>], iteration_bounds = array<i64: 1>, scalar_prefetch = 0 : i64, scratch_operands = 0 : i64, tpu.core_type = #tpu.core_type<tc>, window_params = [{transform_indices = @transform_0, window_bounds = array<i64: 128, 128>}, {pipeline_mode = #tpu.pipeline_mode<synchronous>, transform_indices = @transform_1, window_bounds = array<i64: 1, 128>}, {transform_indices = @transform_2, window_bounds = array<i64: 1>}, {transform_indices = @transform_3, window_bounds = array<i64: 1, 128>}]} {
    %c0 = arith.constant 0 : index
    %c0_0 = arith.constant 0 : index
    %0 = vector.load %arg1[%c0, %c0_0] : memref<128x128xf32, #tpu.memory_space<vmem>>, vector<128x128xf32>
    %c0_1 = arith.constant 0 : index
    %c0_2 = arith.constant 0 : index
    %1 = vector.load %arg2[%c0_1, %c0_2] : memref<1x128xf32, #tpu.memory_space<vmem>>, vector<1x128xf32>
    %2 = vector.broadcast %1 : vector<1x128xf32> to vector<128x128xf32>
    %3 = arith.mulf %0, %2 : vector<128x128xf32>
    %cst = arith.constant dense<0.000000e+00> : vector<128xf32>
    %4 = vector.multi_reduction <add>, %3, %cst [1] : vector<128x128xf32> to vector<128xf32>
    %c0_3 = arith.constant 0 : index
    %5 = memref.load %arg3[%c0_3] : memref<1xf32, #tpu.memory_space<smem>>
    %6 = vector.broadcast %5 : f32 to vector<128xf32>
    %7 = arith.addf %4, %6 : vector<128xf32>
    %c0_4 = arith.constant 0 : index
    %c0_5 = arith.constant 0 : index
    %8 = vector.load %arg4[%c0_4, %c0_5] : memref<1x128xf32, #tpu.memory_space<vmem>>, vector<1x128xf32>
    %9 = vector.shape_cast %8 : vector<1x128xf32> to vector<128xf32>
    %10 = vector.shape_cast %7 : vector<128xf32> to vector<1x128xf32>
    tpu.vector_store %arg4[%c0_4, %c0_5], %10 {strides = array<i32>} : memref<1x128xf32, #tpu.memory_space<vmem>>, vector<1x128xf32>,
    return
  }
  func.func @transform_0(%arg0: i32) -> (i32, i32) {
    %c0_i32 = arith.constant 0 : i32
    %c0_i32_0 = arith.constant 0 : i32
    return %arg0, %c0_i32 : i32, i32
  }
  func.func @transform_1(%arg0: i32) -> (i32, i32) {
    %c0_i32 = arith.constant 0 : i32
    %c0_i32_0 = arith.constant 0 : i32
    %c0_i32_1 = arith.constant 0 : i32
    return %c0_i32, %c0_i32_0 : i32, i32
  }
  func.func @transform_2(%arg0: i32) -> i32 {
    %c0_i32 = arith.constant 0 : i32
    %c0_i32_0 = arith.constant 0 : i32
    return %c0_i32 : i32
  }
  func.func @transform_3(%arg0: i32) -> (i32, i32) {
    %c0_i32 = arith.constant 0 : i32
    %c0_i32_0 = arith.constant 0 : i32
    return %c0_i32, %arg0 : i32, i32
  }
}

</mosaic_0001>

<bundles_post_ra>
// kernel: question_asking_agent_forward.1
= control target key start
LH: loop header
LB: loop body
LE: loop exit
PB: predicated region body
PF: predicated region fallthrough
CT: control target
= control target key end

     0   :  { %v120_v33 = vlaneseq  ;;  %vm131_vm0 = vcmask 130112   ;;  %vm138_vm1 = vcmask 195712   ;;  %vm145_vm2 = vcmask 261312   ;;  %s369_s0 = inlined_call_operand.vmem [shape: f32[128,128], index: 0, kind: input, shape index: {}]   ;;  %s370_s1 = inlined_call_operand.vmem [shape: f32[1,128], index: 1, kind: input, shape index: {}]   ;;  %s371_s2 = inlined_call_operand.<no memory space> [shape: f32[1], index: 2, kind: input, shape index: {}]   ;;  %s372_s3 = inlined_call_operand.vmem [shape: f32[1,128], index: 3, kind: output, shape index: {}]  }
   0x1   :  { %v15_v0 = vld [vmem:[%s369_s0] sm:$0xff]  ;;  %v17_v2 = vld [vmem:[%s369_s0 + $0x10] sm:$0xff]  ;;  %v16_v5 = vld [vmem:[%s369_s0 + $0x8] sm:$0xff]  ;;  %v318_v38 = vstv %s371_s2  ;;  %vm152_vm3 = vcmask 326912   ;;  %vm159_vm4 = vcmask 392512   ;;  %vm166_vm5 = vcmask 458112  }
   0x2   :  { %v237_v1 = vld [vmem:[%s370_s1] ss:$0 sm:$0xff]  ;;  %v18_v6 = vld [vmem:[%s369_s0 + $0x18] sm:$0xff]  ;;  %v20_v10 = vld [vmem:[%s369_s0 + $0x28] sm:$0xff]  ;;  %v309_v34 = vand.u32 127, %v120_v33  ;;  %v311_v35 = vshrl.u32 %v120_v33, 7 }
   0x3   :  { %v38_v3 = vmul.f32 %v237_v1, %v15_v0  ;;  %v40_v4 = vmul.f32 %v237_v1, %v17_v2  ;;  %v39_v7 = vmul.f32 %v237_v1, %v16_v5  ;;  %v41_v8 = vmul.f32 %v237_v1, %v18_v6  ;;  %v19_v9 = vld [vmem:[%s369_s0 + $0x20] sm:$0xff]  ;;  %v21_v13 = vld [vmem:[%s369_s0 + $0x30] sm:$0xff]  ;;  %v22_v14 = vld [vmem:[%s369_s0 + $0x38] sm:$0xff] }
   0x4   :  { %v42_v11 = vmul.f32 %v237_v1, %v19_v9  ;;  %v43_v12 = vmul.f32 %v237_v1, %v20_v10  ;;  %v44_v15 = vmul.f32 %v237_v1, %v21_v13  ;;  %v45_v16 = vmul.f32 %v237_v1, %v22_v14  ;;  %v23_v17 = vld [vmem:[%s369_s0 + $0x40] sm:$0xff]  ;;  %v24_v18 = vld [vmem:[%s369_s0 + $0x48] sm:$0xff]  ;;  %v25_v21 = vld [vmem:[%s369_s0 + $0x50] sm:$0xff] }
   0x5   :  { %54 = vadd.xlane.f32.xlu0 %v38_v3  ;;  %58 = vadd.xlane.f32.xlu1 %v40_v4  ;;  %v46_v19 = vmul.f32 %v237_v1, %v23_v17  ;;  %v47_v20 = vmul.f32 %v237_v1, %v24_v18  ;;  %v26_v22 = vld [vmem:[%s369_s0 + $0x58] sm:$0xff]  ;;  %v48_v23 = vmul.f32 %v237_v1, %v25_v21  ;;  %v27_v25 = vld [vmem:[%s369_s0 + $0x60] sm:$0xff]  ;;  %v28_v26 = vld [vmem:[%s369_s0 + $0x68] sm:$0xff]  ;;  %v126_v36 = vadd.s32 4294967288, %v309_v34 }
   0x6   :  { %v49_v24 = vmul.f32 %v237_v1, %v26_v22  ;;  %v50_v27 = vmul.f32 %v237_v1, %v27_v25  ;;  %v51_v28 = vmul.f32 %v237_v1, %v28_v26  ;;  %v29_v29 = vld [vmem:[%s369_s0 + $0x70] sm:$0xff]  ;;  %v30_v30 = vld [vmem:[%s369_s0 + $0x78] sm:$0xff]  ;;  %v140_v37 = vadd.s32 4294967272, %v309_v34 }
   0x7   :  { %v52_v31 = vmul.f32 %v237_v1, %v29_v29  ;;  %v53_v32 = vmul.f32 %v237_v1, %v30_v30  ;;  %v133_v40 = vadd.s32 4294967280, %v309_v34  ;;  %v147_v42 = vadd.s32 4294967264, %v309_v34 }
   0x8   :  { %v124_v43 = vsub.s32 %v309_v34, %v311_v35  ;;  %v129_v45 = vsub.s32 %v126_v36, %v311_v35  ;;  %v143_v46 = vsub.s32 %v140_v37, %v311_v35  ;;  %v154_v51 = vadd.s32 4294967256, %v309_v34 }
   0x9   :  { %56 = vadd.xlane.f32.xlu0 %v39_v7  ;;  %60 = vadd.xlane.f32.xlu1 %v41_v8  ;;  %v136_v47 = vsub.s32 %v133_v40, %v311_v35  ;;  %v150_v54 = vsub.s32 %v147_v42, %v311_v35  ;;  %v161_v58 = vadd.s32 4294967248, %v309_v34  ;;  %v168_v63 = vadd.s32 4294967240, %v309_v34 }
   0xa   :  { %v157_v61 = vsub.s32 %v154_v51, %v311_v35  ;;  %v175_v7 = vadd.s32 4294967232, %v309_v34  ;;  %v189_v18 = vadd.s32 4294967216, %v309_v34  ;;  %vm173_vm6 = vcmask 523712  }
   0xb   :  { %v164_v6 = vsub.s32 %v161_v58, %v311_v35  ;;  %v171_v10 = vsub.s32 %v168_v63, %v311_v35  ;;  %vm180_vm7 = vcmask 589312   ;;  %v203_v30 = vadd.s32 4294967200, %v309_v34 }
   0xc   :  { %v178_v17 = vsub.s32 %v175_v7, %v311_v35  ;;  %v192_v29 = vsub.s32 %v189_v18, %v311_v35  ;;  %vm187_vm8 = vcmask 654912   ;;  %vm194_vm9 = vcmask 720512  }
   0xd   :  { %62 = vadd.xlane.f32.xlu0 %v42_v11  ;;  %64 = vadd.xlane.f32.xlu1 %v43_v12  ;;  %v182_v12 = vadd.s32 4294967224, %v309_v34  ;;  %vm201_vm10 = vcmask 786112   ;;  %vm208_vm11 = vcmask 851712   ;;  %vm215_vm12 = vcmask 917312  }
   0xe   :  { %vm222_vm13 = vcmask 982912   ;;  %vm229_vm14 = vcmask 1048512  }
   0xf   :  { %v185_v22 = vsub.s32 %v182_v12, %v311_v35 }
  0x11   :  { %66 = vadd.xlane.f32.xlu0 %v44_v15  ;;  %68 = vadd.xlane.f32.xlu1 %v45_v16 }
  0x15   :  { %70 = vadd.xlane.f32.xlu0 %v46_v19  ;;  %72 = vadd.xlane.f32.xlu1 %v47_v20 }
  0x19   :  { %74 = vadd.xlane.f32.xlu0 %v48_v23  ;;  %76 = vadd.xlane.f32.xlu1 %v49_v24  ;;  %v196_v24 = vadd.s32 4294967208, %v309_v34 }
  0x1b   :  { %v199_v36 = vsub.s32 %v196_v24, %v311_v35 }
  0x1d   :  { %78 = vadd.xlane.f32.xlu0 %v50_v27  ;;  %80 = vadd.xlane.f32.xlu1 %v51_v28 }
  0x21   :  { %82 = vadd.xlane.f32.xlu0 %v52_v31  ;;  %84 = vadd.xlane.f32.xlu1 %v53_v32 }
  0x8e   :  { %v55_v39 = vpop.xlane.xlu0 %54  ;;  %v59_v41 = vpop.xlane.xlu1 %58 }
  0x8f   :  { %v88_v44 = vadd.f32 %v318_v38, %v55_v39  ;;  %v90_v48 = vadd.f32 %v318_v38, %v59_v41  ;;  %v210_v39 = vadd.s32 4294967192, %v309_v34 }
  0x91   :  { %v125_v55 = vrot.slane %v88_v44, %v124_v43  ;;  %v137_v59 = vrot.slane %v90_v48, %v136_v47  ;;  %v206_v44 = vsub.s32 %v203_v30, %v311_v35 }
  0x92   :  { %v57_v49 = vpop.xlane.xlu0 %56  ;;  %v61_v50 = vpop.xlane.xlu1 %60 }
  0x93   :  { %v89_v52 = vadd.f32 %v318_v38, %v57_v49  ;;  %v91_v53 = vadd.f32 %v318_v38, %v61_v50  ;;  %v213_v50 = vsub.s32 %v210_v39, %v311_v35 }
  0x95   :  { %v130_v56 = vrot.slane %v89_v52, %v129_v45  ;;  %v144_v57 = vrot.slane %v91_v53, %v143_v46  ;;  %v217_v45 = vadd.s32 4294967184, %v309_v34  ;;  %v224_v46 = vadd.s32 4294967176, %v309_v34 }
  0x96   :  { %v63_v60 = vpop.xlane.xlu0 %62  ;;  %v65_v62 = vpop.xlane.xlu1 %64 }
  0x97   :  { %v132_v0 = vsel %vm131_vm0, %v130_v56, %v125_v55  ;;  %v92_v1 = vadd.f32 %v318_v38, %v63_v60  ;;  %v93_v2 = vadd.f32 %v318_v38, %v65_v62  ;;  %v220_v56 = vsub.s32 %v217_v45, %v311_v35 }
  0x98   :  { %v139_v3 = vsel %vm138_vm1, %v137_v59, %v132_v0 }
  0x99   :  { %v146_v4 = vsel %vm145_vm2, %v144_v57, %v139_v3  ;;  %v151_v5 = vrot.slane %v92_v1, %v150_v54  ;;  %v158_v8 = vrot.slane %v93_v2, %v157_v61  ;;  %v227_v57 = vsub.s32 %v224_v46, %v311_v35 }
  0x9a   :  { %v67_v9 = vpop.xlane.xlu0 %66  ;;  %v69_v11 = vpop.xlane.xlu1 %68 }
  0x9b   :  { %v153_v13 = vsel %vm152_vm3, %v151_v5, %v146_v4  ;;  %v94_v14 = vadd.f32 %v318_v38, %v67_v9  ;;  %v95_v15 = vadd.f32 %v318_v38, %v69_v11 }
  0x9c   :  { %v160_v19 = vsel %vm159_vm4, %v158_v8, %v153_v13 }
  0x9d   :  { %v165_v16 = vrot.slane %v94_v14, %v164_v6  ;;  %v172_v20 = vrot.slane %v95_v15, %v171_v10 }
  0x9e   :  { %v71_v21 = vpop.xlane.xlu0 %70  ;;  %v73_v23 = vpop.xlane.xlu1 %72 }
  0x9f   :  { %v167_v25 = vsel %vm166_vm5, %v165_v16, %v160_v19  ;;  %v96_v26 = vadd.f32 %v318_v38, %v71_v21  ;;  %v97_v27 = vadd.f32 %v318_v38, %v73_v23 }
  0xa0   :  { %v174_v31 = vsel %vm173_vm6, %v172_v20, %v167_v25 }
  0xa1   :  { %v179_v28 = vrot.slane %v96_v26, %v178_v17  ;;  %v186_v32 = vrot.slane %v97_v27, %v185_v22 }
  0xa2   :  { %v75_v33 = vpop.xlane.xlu0 %74  ;;  %v77_v37 = vpop.xlane.xlu1 %76 }
  0xa3   :  { %v181_v40 = vsel %vm180_vm7, %v179_v28, %v174_v31  ;;  %v98_v41 = vadd.f32 %v318_v38, %v75_v33  ;;  %v99_v42 = vadd.f32 %v318_v38, %v77_v37 }
  0xa4   :  { %v188_v47 = vsel %vm187_vm8, %v186_v32, %v181_v40 }
  0xa5   :  { %v193_v43 = vrot.slane %v98_v41, %v192_v29  ;;  %v200_v48 = vrot.slane %v99_v42, %v199_v36 }
  0xa6   :  { %v79_v49 = vpop.xlane.xlu0 %78  ;;  %v81_v51 = vpop.xlane.xlu1 %80 }
  0xa7   :  { %v195_v52 = vsel %vm194_vm9, %v193_v43, %v188_v47  ;;  %v100_v53 = vadd.f32 %v318_v38, %v79_v49  ;;  %v101_v54 = vadd.f32 %v318_v38, %v81_v51 }
  0xa8   :  { %v202_v58 = vsel %vm201_vm10, %v200_v48, %v195_v52 }
  0xa9   :  { %v207_v55 = vrot.slane %v100_v53, %v206_v44  ;;  %v214_v34 = vrot.slane %v101_v54, %v213_v50 }
  0xaa   :  { %v83_v59 = vpop.xlane.xlu0 %82  ;;  %v85_v60 = vpop.xlane.xlu1 %84 }
  0xab   :  { %v209_v61 = vsel %vm208_vm11, %v207_v55, %v202_v58  ;;  %v102_v62 = vadd.f32 %v318_v38, %v83_v59  ;;  %v103_v63 = vadd.f32 %v318_v38, %v85_v60 }
  0xac   :  { %v216_v2 = vsel %vm215_vm12, %v214_v34, %v209_v61 }
  0xad   :  { %v221_v0 = vrot.slane %v102_v62, %v220_v56  ;;  %v228_v1 = vrot.slane %v103_v63, %v227_v57 }
  0xaf   :  { %v223_v3 = vsel %vm222_vm13, %v221_v0, %v216_v2 }
  0xb0   :  { %v230_v4 = vsel %vm229_vm14, %v228_v1, %v223_v3 }
  0xb1   :  { %232 = vst [vmem:[%s372_s3] sm:$0x1] %v230_v4 }

</bundles_post_ra>
